<compile_context>
chip_gen: v5e
topology: v5e:2x2
jax: 0.10.0
libtpu: 0.0.40
codegen_flags: <defaults>
</compile_context>

<pallas_src>
import jax
import jax.numpy as jnp
from jax.experimental import pallas as pl
from jax.experimental.pallas import tpu as pltpu


def _wide_shallow_kernel(x_ref, w1_ref, b1_ref, w2_ref, b2_ref, o_ref, acc_ref):
    # x:(TB,F) w1:(F,TH) b1:(1,TH) w2:(1,TH) b2:(1,1 SMEM) o:(TB,1) acc:(NBT,TB,1)
    h_idx = pl.program_id(0)   # hidden (reduction) axis -- OUTER
    b_idx = pl.program_id(1)   # batch axis              -- INNER

    # Layer 1 on the MXU with f32 accumulation; bias + ReLU on the VPU.
    h = jnp.dot(x_ref[...], w1_ref[...], preferred_element_type=jnp.float32)
    h = jnp.maximum(h + b1_ref[...].astype(jnp.float32), 0.0)

    # Layer 2 (output width 1): VPU multiply + XLU lane reduce, no N=1 matmul.
    partial = jnp.sum(h * w2_ref[...].astype(jnp.float32), axis=-1, keepdims=True)

    @pl.when(h_idx == 0)
    def _init():
        acc_ref[b_idx] = partial

    @pl.when(h_idx != 0)
    def _accumulate():
        acc_ref[b_idx] += partial

    @pl.when(h_idx == pl.num_programs(0) - 1)
    def _finalize():
        o_ref[...] = (acc_ref[b_idx] + b2_ref[0, 0]).astype(o_ref.dtype)


def _round_up(v, m):
    return ((v + m - 1) // m) * m


def _physical_vmem_bytes():
    """Physical per-core VMEM; falls back to the smallest case (v7x, 64 MiB)."""
    try:
        return int(pltpu.get_tpu_info().vmem_capacity_bytes)
    except Exception:
        return 64 << 20


def _largest_aligned_divisor(total, upper, aligns):
    """Largest t <= upper with total % t == 0 and t a multiple of some align."""
    for a in aligns:
        t = (upper // a) * a
        while t >= a:
            if total % t == 0:
                return t
            t -= a
    return None


def _plan_tiles(B, F, H, x_itemsize, w_itemsize):
    cap = _physical_vmem_bytes()
    # Per-generation budget for the double-buffered w1 stream.
    w1_budget = (24 << 20) if cap <= (64 << 20) else (32 << 20)
    x_budget = min(8 << 20, cap // 8)

    x_sub = max(8, 32 // x_itemsize)      # sublane multiple for x dtype packing
    w_sub = max(8, 32 // w_itemsize)
    f_lanes = max(_round_up(F, 128), 128)

    # ---- batch tile: prefer a single block so w1 AND x are read exactly once.
    def x_block_bytes(tb):
        return 2 * _round_up(tb, x_sub) * f_lanes * x_itemsize

    if x_block_bytes(B) <= x_budget:
        tb = B
    else:
        tb = None
        t = (x_budget // (2 * f_lanes * x_itemsize)) // x_sub * x_sub
        while t >= x_sub:
            if B % t == 0:
                tb = t
                break
            t -= x_sub
        if tb is None:
            # Ragged batch with no aligned divisor: single block, raised limit.
            # TODO(synk): masked ragged batch tiling for huge indivisible B.
            tb = B
    nbt = 1 if tb == B else B // tb

    # ---- hidden tile: fill the w1 budget with a lane-aligned divisor of H
    # (amortizes the ~0.35 us fixed per-grid-step pipeline cost).
    per_col = 2 * _round_up(F, w_sub) * w_itemsize + 2 * 2 * 8 * w_itemsize
    max_th = max(128, w1_budget // per_col)
    if H <= max_th:
        th = H
    else:
        th = _largest_aligned_divisor(H, max_th, (512, 256, 128))
        if th is None:
            th = H  # no clean lane-aligned divisor: full H, limit raised below
    nht = H // th

    # ---- working-set estimate (padded to (sublane, 128-lane) tiles).
    ws = (
        x_block_bytes(tb)
        + 2 * _round_up(F, w_sub) * _round_up(th, 128) * w_itemsize      # w1 x2
        + 2 * 2 * 8 * _round_up(th, 128) * w_itemsize                    # b1,w2 x2
        + nbt * _round_up(tb, 8) * 128 * 4                               # acc slab
        + 2 * _round_up(tb, 8) * 128 * x_itemsize                        # out x2
    )
    vmem_limit = max(32 << 20, int(ws * 1.25) + (4 << 20))
    vmem_limit = min(vmem_limit, cap - (4 << 20))
    return tb, nbt, th, nht, vmem_limit


def wide_shallow_forward(x, w1, b1, w2, b2, *, w1_buffers=None):
    """relu(x @ w1 + b1) @ w2.T + b2, with w2 stored as a (1, H) row.

    `w1_buffers` optionally deepens the w1 pipeline (pl.Buffered) -- a knob to
    sweep on v7x where per-tile DMA time is short; default (None) keeps 2.
    """
    B, F = x.shape
    Fw, H = w1.shape
    assert F == Fw, (F, Fw)
    assert b1.shape == (1, H), b1.shape
    assert w2.shape == (1, H), w2.shape
    assert b2.shape == (1, 1), b2.shape

    x_item = jnp.dtype(x.dtype).itemsize
    w_item = jnp.dtype(w1.dtype).itemsize
    tb, nbt, th, nht, vmem_limit = _plan_tiles(B, F, H, x_item, w_item)

    w1_spec_kwargs = {}
    if w1_buffers is not None and w1_buffers != 2:
        w1_spec_kwargs["pipeline_mode"] = pl.Buffered(w1_buffers)

    return pl.pallas_call(
        _wide_shallow_kernel,
        out_shape=jax.ShapeDtypeStruct((B, 1), x.dtype),
        grid_spec=pltpu.PrefetchScalarGridSpec(
            num_scalar_prefetch=0,
            grid=(nht, nbt),                                  # hidden OUTER, batch INNER
            in_specs=[
                pl.BlockSpec((tb, F), lambda h, b: (b, 0)),            # x
                pl.BlockSpec((F, th), lambda h, b: (0, h),             # w1: streamed once
                             **w1_spec_kwargs),
                pl.BlockSpec((1, th), lambda h, b: (0, h)),            # b1
                pl.BlockSpec((1, th), lambda h, b: (0, h)),            # w2 row
                pl.BlockSpec(memory_space=pltpu.MemorySpace.SMEM),     # b2 scalar
            ],
            out_specs=pl.BlockSpec((tb, 1), lambda h, b: (b, 0)),
            scratch_shapes=[pltpu.VMEM((nbt, tb, 1), jnp.float32)],
        ),
        compiler_params=pltpu.CompilerParams(
            # Memory-bound: one TC saturates HBM; a batch-parallel megacore
            # split on v7x would re-stream w1 per core (2x HBM traffic).
            dimension_semantics=("arbitrary", "arbitrary"),
            vmem_limit_bytes=vmem_limit,
        ),
    )(x, w1, b1, w2, b2)


def init_params(key, input_feature, hidden_size, dtype=jnp.float32):
    """Matches PyTorch nn.Linear init U(-1/sqrt(fan_in), 1/sqrt(fan_in)).
    w1 is (in, out); w2 is stored as a (1, hidden) ROW for the kernel."""
    k1, k2, k3, k4 = jax.random.split(key, 4)
    bound1 = 1.0 / jnp.sqrt(input_feature)
    bound2 = 1.0 / jnp.sqrt(hidden_size)
    w1 = jax.random.uniform(k1, (input_feature, hidden_size), dtype, -bound1, bound1)
    b1 = jax.random.uniform(k2, (1, hidden_size), dtype, -bound1, bound1)
    w2 = jax.random.uniform(k3, (1, hidden_size), dtype, -bound2, bound2)
    b2 = jax.random.uniform(k4, (1, 1), dtype, -bound2, bound2)
    return w1, b1, w2, b2


if __name__ == "__main__":
    batch = 8
    input_feature = 16
    hidden_size = 32

    key = jax.random.PRNGKey(0)
    kx, kp = jax.random.split(key)
    x = jax.random.normal(kx, (batch, input_feature), jnp.float32)
    w1, b1, w2, b2 = init_params(kp, input_feature, hidden_size)

    # f32 path vs pure-JAX reference.
    out = jax.block_until_ready(wide_shallow_forward(x, w1, b1, w2, b2))
    ref = jnp.maximum(x @ w1 + b1, 0.0) @ w2.T + b2
    assert out.shape == (batch, 1), out.shape
    assert jnp.allclose(out, ref, atol=1e-5, rtol=1e-5), "f32 mismatch vs reference"

    # bf16 x / w1 (halves the dominant w1 HBM traffic); biases + tiny w2 stay
    # f32, accumulation stays f32 inside the kernel.
    x_bf = x.astype(jnp.bfloat16)
    w1_bf = w1.astype(jnp.bfloat16)
    out_bf = jax.block_until_ready(wide_shallow_forward(x_bf, w1_bf, b1, w2, b2))
    ref_bf = (jnp.maximum(x_bf.astype(jnp.float32) @ w1_bf.astype(jnp.float32) + b1, 0.0)
              @ w2.T + b2)
    assert out_bf.shape == (batch, 1), out_bf.shape
    assert jnp.allclose(out_bf.astype(jnp.float32), ref_bf, atol=5e-2, rtol=5e-2), \
        "bf16 mismatch vs reference"

    print("KERNEL_OK")
</pallas_src>

<mosaic_0001>
module attributes {stable_mosaic.version = 11 : i64} {
  func.func @_wide_shallow_kernel(%arg0: i32, %arg1: i32, %arg2: memref<8x16xf32, #tpu.memory_space<vmem>>, %arg3: memref<16x32xf32, #tpu.memory_space<vmem>>, %arg4: memref<1x32xf32, #tpu.memory_space<vmem>>, %arg5: memref<1x32xf32, #tpu.memory_space<vmem>>, %arg6: memref<1x1xf32, #tpu.memory_space<smem>>, %arg7: memref<8x1xf32, #tpu.memory_space<vmem>>, %arg8: memref<1x8x1xf32, #tpu.memory_space<vmem>>) attributes {dimension_semantics = [#tpu.dimension_semantics<arbitrary>, #tpu.dimension_semantics<arbitrary>], iteration_bounds = array<i64: 1, 1>, scalar_prefetch = 0 : i64, scratch_operands = 1 : i64, tpu.core_type = #tpu.core_type<tc>, window_params = [{transform_indices = @transform_0, window_bounds = array<i64: 8, 16>}, {transform_indices = @transform_1, window_bounds = array<i64: 16, 32>}, {transform_indices = @transform_2, window_bounds = array<i64: 1, 32>}, {transform_indices = @transform_3, window_bounds = array<i64: 1, 32>}, {transform_indices = @transform_4, window_bounds = array<i64: 1, 1>}, {transform_indices = @transform_5, window_bounds = array<i64: 8, 1>}]} {
    %c0 = arith.constant 0 : index
    %c0_0 = arith.constant 0 : index
    %0 = vector.load %arg2[%c0, %c0_0] : memref<8x16xf32, #tpu.memory_space<vmem>>, vector<8x16xf32>
    %c0_1 = arith.constant 0 : index
    %c0_2 = arith.constant 0 : index
    %1 = vector.load %arg3[%c0_1, %c0_2] : memref<16x32xf32, #tpu.memory_space<vmem>>, vector<16x32xf32>
    %cst = arith.constant dense<0.000000e+00> : vector<8x32xf32>
    %2 = tpu.matmul %0, %1, %cst {dimension_numbers = #tpu.dot_dimension_numbers<[1], [0], [0], [1], [0, 0, 1, 1], [], []>} : vector<8x16xf32>, vector<16x32xf32>, vector<8x32xf32> -> vector<8x32xf32>
    %c0_3 = arith.constant 0 : index
    %c0_4 = arith.constant 0 : index
    %3 = vector.load %arg4[%c0_3, %c0_4] : memref<1x32xf32, #tpu.memory_space<vmem>>, vector<1x32xf32>
    %4 = vector.broadcast %3 : vector<1x32xf32> to vector<8x32xf32>
    %5 = arith.addf %2, %4 : vector<8x32xf32>
    %cst_5 = arith.constant 0.000000e+00 : f32
    %6 = vector.broadcast %cst_5 : f32 to vector<8x32xf32>
    %7 = arith.maximumf %5, %6 : vector<8x32xf32>
    %c0_6 = arith.constant 0 : index
    %c0_7 = arith.constant 0 : index
    %8 = vector.load %arg5[%c0_6, %c0_7] : memref<1x32xf32, #tpu.memory_space<vmem>>, vector<1x32xf32>
    %9 = vector.broadcast %8 : vector<1x32xf32> to vector<8x32xf32>
    %10 = arith.mulf %7, %9 : vector<8x32xf32>
    %cst_8 = arith.constant dense<0.000000e+00> : vector<8xf32>
    %11 = vector.multi_reduction <add>, %10, %cst_8 [1] : vector<8x32xf32> to vector<8xf32>
    %12 = vector.shape_cast %11 : vector<8xf32> to vector<8x1xf32>
    %c0_i32 = arith.constant 0 : i32
    %13 = arith.cmpi eq, %arg0, %c0_i32 : i32
    %14 = arith.extui %13 : i1 to i32
    %c0_i32_9 = arith.constant 0 : i32
    %15 = arith.cmpi ne, %14, %c0_i32_9 : i32
    scf.if %15 {
      %22 = arith.index_cast %arg1 : i32 to index
      %c0_14 = arith.constant 0 : index
      %c0_15 = arith.constant 0 : index
      %23 = vector.load %arg8[%22, %c0_14, %c0_15] : memref<1x8x1xf32, #tpu.memory_space<vmem>>, vector<1x8x1xf32>
      %24 = vector.shape_cast %23 : vector<1x8x1xf32> to vector<8x1xf32>
      %25 = vector.shape_cast %12 : vector<8x1xf32> to vector<1x8x1xf32>
      tpu.vector_store %arg8[%22, %c0_14, %c0_15], %25 {strides = array<i32>} : memref<1x8x1xf32, #tpu.memory_space<vmem>>, vector<1x8x1xf32>,
    } else {
    }
    %c0_i32_10 = arith.constant 0 : i32
    %16 = arith.cmpi ne, %arg0, %c0_i32_10 : i32
    %17 = arith.extui %16 : i1 to i32
    %c0_i32_11 = arith.constant 0 : i32
    %18 = arith.cmpi ne, %17, %c0_i32_11 : i32
    scf.if %18 {
      %22 = arith.index_cast %arg1 : i32 to index
      %c0_14 = arith.constant 0 : index
      %c0_15 = arith.constant 0 : index
      %23 = vector.load %arg8[%22, %c0_14, %c0_15] : memref<1x8x1xf32, #tpu.memory_space<vmem>>, vector<1x8x1xf32>
      %24 = vector.shape_cast %23 : vector<1x8x1xf32> to vector<8x1xf32>
      %25 = arith.addf %24, %12 : vector<8x1xf32>
      %26 = arith.index_cast %arg1 : i32 to index
      %c0_16 = arith.constant 0 : index
      %c0_17 = arith.constant 0 : index
      %27 = vector.load %arg8[%26, %c0_16, %c0_17] : memref<1x8x1xf32, #tpu.memory_space<vmem>>, vector<1x8x1xf32>
      %28 = vector.shape_cast %27 : vector<1x8x1xf32> to vector<8x1xf32>
      %29 = vector.shape_cast %25 : vector<8x1xf32> to vector<1x8x1xf32>
      tpu.vector_store %arg8[%26, %c0_16, %c0_17], %29 {strides = array<i32>} : memref<1x8x1xf32, #tpu.memory_space<vmem>>, vector<1x8x1xf32>,
    } else {
    }
    %c0_i32_12 = arith.constant 0 : i32
    %19 = arith.cmpi eq, %arg0, %c0_i32_12 : i32
    %20 = arith.extui %19 : i1 to i32
    %c0_i32_13 = arith.constant 0 : i32
    %21 = arith.cmpi ne, %20, %c0_i32_13 : i32
    scf.if %21 {
      %22 = arith.index_cast %arg1 : i32 to index
      %c0_14 = arith.constant 0 : index
      %c0_15 = arith.constant 0 : index
      %23 = vector.load %arg8[%22, %c0_14, %c0_15] : memref<1x8x1xf32, #tpu.memory_space<vmem>>, vector<1x8x1xf32>
      %24 = vector.shape_cast %23 : vector<1x8x1xf32> to vector<8x1xf32>
      %c0_16 = arith.constant 0 : index
      %c0_17 = arith.constant 0 : index
      %25 = memref.load %arg6[%c0_16, %c0_17] : memref<1x1xf32, #tpu.memory_space<smem>>
      %26 = vector.broadcast %25 : f32 to vector<8x1xf32>
      %27 = arith.addf %24, %26 : vector<8x1xf32>
      %c0_18 = arith.constant 0 : index
      %c0_19 = arith.constant 0 : index
      %28 = vector.load %arg7[%c0_18, %c0_19] : memref<8x1xf32, #tpu.memory_space<vmem>>, vector<8x1xf32>
      tpu.vector_store %arg7[%c0_18, %c0_19], %27 {strides = array<i32>} : memref<8x1xf32, #tpu.memory_space<vmem>>, vector<8x1xf32>,
    } else {
    }
    return
  }
  func.func @transform_0(%arg0: i32, %arg1: i32) -> (i32, i32) {
    %c0_i32 = arith.constant 0 : i32
    %c0_i32_0 = arith.constant 0 : i32
    return %arg1, %c0_i32 : i32, i32
  }
  func.func @transform_1(%arg0: i32, %arg1: i32) -> (i32, i32) {
    %c0_i32 = arith.constant 0 : i32
    %c0_i32_0 = arith.constant 0 : i32
    return %c0_i32, %arg0 : i32, i32
  }
  func.func @transform_2(%arg0: i32, %arg1: i32) -> (i32, i32) {
    %c0_i32 = arith.constant 0 : i32
    %c0_i32_0 = arith.constant 0 : i32
    return %c0_i32, %arg0 : i32, i32
  }
  func.func @transform_3(%arg0: i32, %arg1: i32) -> (i32, i32) {
    %c0_i32 = arith.constant 0 : i32
    %c0_i32_0 = arith.constant 0 : i32
    return %c0_i32, %arg0 : i32, i32
  }
  func.func @transform_4(%arg0: i32, %arg1: i32) -> (i32, i32) {
    %c0_i32 = arith.constant 0 : i32
    %c0_i32_0 = arith.constant 0 : i32
    %c0_i32_1 = arith.constant 0 : i32
    return %c0_i32, %c0_i32_0 : i32, i32
  }
  func.func @transform_5(%arg0: i32, %arg1: i32) -> (i32, i32) {
    %c0_i32 = arith.constant 0 : i32
    %c0_i32_0 = arith.constant 0 : i32
    return %arg1, %c0_i32 : i32, i32
  }
}

</mosaic_0001>

<bundles_post_ra>
// kernel: tpu_custom_call.1
= control target key start
LH: loop header
LB: loop body
LE: loop exit
PB: predicated region body
PF: predicated region fallthrough
CT: control target
= control target key end

     0   :  { %11 = vsyncpa [#allocation5], 0  ;;  %s238_s0 = inlined_call_operand.hbm [shape: f32[8,16], index: 0, kind: input, shape index: {}]   ;;  %s239_s1 = inlined_call_operand.hbm [shape: f32[16,32], index: 1, kind: input, shape index: {}]   ;;  %s240_s2 = inlined_call_operand.vmem [shape: f32[1,32], index: 2, kind: input, shape index: {}]   ;;  %s241_s3 = inlined_call_operand.vmem [shape: f32[1,32], index: 3, kind: input, shape index: {}]   ;;  %s242_s4 = inlined_call_operand.<no memory space> [shape: f32[1,1], index: 4, kind: input, shape index: {}]   ;;  %s243_s5 = inlined_call_operand.vmem [shape: f32[8,1], index: 5, kind: output, shape index: {}]  }
   0x1   :  { %s18_s20 = sshll.u32 %s238_s0, 4  ;;  %s19_s20 = int_to_ptr.hbm [resolvable:$true] %s18_s20 }
   0x2   :  { %12 = vsyncpa [#allocation7], 0  ;;  %s186_s21 = smov [#allocation4]   ;;  %s28_s25 = sshll.u32 %s239_s1, 4  ;;  %s29_s25 = int_to_ptr.hbm [resolvable:$true] %s28_s25 }
   0x3   :  { %s20_s22 = sshll.u32 %s186_s21, 4  ;;  %s187_s26 = smov [#allocation6]   ;;  %s21_s22 = int_to_ptr.vmem [resolvable:$true] %s20_s22 }
   0x4   :  { %23 = dma.hbm_to_vmem [thread:$0]  %s19_s20, 128, %s21_s22, [#allocation5]  }
   0x5   :  { %s30_s27 = sshll.u32 %s187_s26, 4  ;;  %s188_s28 = smov 128   ;;  %s31_s27 = int_to_ptr.vmem [resolvable:$true] %s30_s27 }
   0x6   :  { %s189_s29 = smov 8  }
   0x7   :  { %36 = dma.hbm_to_vmem [thread:$0]  %s29_s25, 256, %s31_s27, [#allocation7], %s188_s28, %s188_s28, %s189_s29  }
   0x8   :  { %182 = dma.done.wait [#allocation5], 128  }
   0x9   :  { %183 = vsyncadd [#allocation5], 4294967168 }
   0xa   :  { %184 = dma.done.wait [#allocation7], 256  }
   0xb   :  { %185 = vsyncadd [#allocation7], 4294967040  ;;  %v53_v0 = vld [vmem:[#allocation6 + $0x8] sm:$0xff]  ;;  %v52_v1 = vld [vmem:[#allocation6] sm:$0xff]  ;;  %vm58_vm0 = vcmask 130048   ;;  %vm88_vm1 = vcmask 261120   ;;  %v117_v11 = vstv %s242_s4 }
   0xc   :  { %76 = vmatpush.msra.mxu0 %v53_v0  ;;  %v51_v2 = vld [vmem:[#allocation4] sm:$0xff]  ;;  %v132_v3 = vld [vmem:[%s240_s2] ss:$0 sm:$0xff]  ;;  %vm98_vm2 = vcmask 7168  }
   0xd   :  { %v133_v6 = vld [vmem:[%s241_s3] ss:$0 sm:$0xff] }
   0xe   :  { %77 = vmatpush.msra.mxu0 %v52_v1 }
   0xf   :  { %127 = vmatmul.msk.f32.vlgmr.msra.gmra.mxu0 %vm58_vm0, %v51_v2 }
  0x8c   :  { %v79_v4 = vpop.f32.mrf.mxu0 }
  0x8d   :  { %v80_v5 = vadd.f32 %v132_v3, %v79_v4 }
  0x8f   :  { %v82_v7 = vmax.f32 %v80_v5, 0.0 }
  0x91   :  { %v87_v8 = vmul.f32 %v133_v6, %v82_v7 }
  0x93   :  { %v89_v9 = vsel %vm88_vm1, %v87_v8, 0.0 }
  0x94   :  { %90 = vadd.xlane.f32.xlu0 %v89_v9 }
 0x107   :  { %v91_v10 = vpop.xlane.xlu0 %90 }
 0x108   :  { %99 = vst.msk [vmem:[#allocation2] sm:$0xff] %vm98_vm2, %v91_v10 }
 0x10f   :  { %v115_v12 = vld [vmem:[#allocation2] sm:$0xff] }
 0x110   :  { %v118_v13 = vadd.f32 %v117_v11, %v115_v12 }
 0x112   :  { %120 = vst.msk [vmem:[%s243_s5] sm:$0xff] %vm98_vm2, %v118_v13 }
 0x113   :  { %125 = vsyncpa [#allocation5], 1 }
 0x114   :  { %126 = vsyncpa [#allocation7], 1 }

</bundles_post_ra>
